<compile_context>
chip_gen: v7x
topology: tpu7x:2x2x1
jax: 0.10.0
libtpu: 0.0.40
codegen_flags: <defaults>
</compile_context>

<pallas_src>
import jax
import jax.numpy as jnp
from jax.experimental import pallas as pl
from jax.experimental.pallas import tpu as pltpu


NEG_INF = -1e9
FEAT_PAD = 128    # feat head padded 64 -> 128 lanes (zero pad lanes)
DEPTH_PAD = 128   # depth bins padded 100 -> 128 lanes (zero-probability pad)


def _round_up(x, m):
    return (x + m - 1) // m * m


# -----------------------------------------------------------------------------
# Pallas kernel 1: point-wise align / fusion MLP + depth-distribution head
# -----------------------------------------------------------------------------
def point_align_kernel(img_ref, pts_ref, wi_ref, bi_ref, wp_ref, bp_ref,
                       w2_ref, b2_ref, feat_ref, prob_ref):
    # layer 1: two MXU matmuls (separate inputs -> no HBM concat), per-branch
    # ReLU before the add (same as the unfused reference), f32 accumulation.
    img_mid = jnp.maximum(
        jnp.dot(img_ref[...].astype(jnp.bfloat16), wi_ref[...],
                preferred_element_type=jnp.float32) + bi_ref[...], 0.0)
    pts_mid = jnp.maximum(
        jnp.dot(pts_ref[...].astype(jnp.bfloat16), wp_ref[...],
                preferred_element_type=jnp.float32) + bp_ref[...], 0.0)
    fused = img_mid + pts_mid                               # (tile, Cm) f32

    # layer 2: packed (Cm, 256) weight; feat head in lanes [0,128),
    # depth logits in lanes [128,256) -> one clean full-width MXU pass.
    y2 = jnp.dot(fused.astype(jnp.bfloat16), w2_ref[...],
                 preferred_element_type=jnp.float32) + b2_ref[...]

    # feat head: pad lanes have zero weight/bias -> relu gives exact zeros.
    feat_ref[...] = jnp.maximum(y2[:, :FEAT_PAD], 0.0)

    # depth head: pad-bin bias is -1e9 -> exp underflows to exactly 0, so the
    # softmax over the 100 real bins is unchanged. Exact division for parity.
    logits = y2[:, FEAT_PAD:]
    m = jnp.max(logits, axis=-1, keepdims=True)
    e = jnp.exp(logits - m)
    prob_ref[...] = e / jnp.sum(e, axis=-1, keepdims=True)


def pack_point_align_params(params):
    """One-time weight packing / bf16 cast (hoisted out of the forward pass)."""
    Cm = params["w_img"].shape[1]
    Co = params["w_out"].shape[1]
    Cd = params["w_dep"].shape[1]
    assert Co <= FEAT_PAD and Cd <= DEPTH_PAD

    w2 = jnp.zeros((Cm, FEAT_PAD + DEPTH_PAD), jnp.float32)
    w2 = w2.at[:, :Co].set(params["w_out"])
    w2 = w2.at[:, FEAT_PAD:FEAT_PAD + Cd].set(params["w_dep"])
    b2 = jnp.full((FEAT_PAD + DEPTH_PAD,), NEG_INF, jnp.float32)
    b2 = b2.at[:Co].set(params["b_out"])
    b2 = b2.at[Co:FEAT_PAD].set(0.0)                 # feat pad lanes -> 0
    b2 = b2.at[FEAT_PAD:FEAT_PAD + Cd].set(params["b_dep"])

    return {
        "w_img": params["w_img"].astype(jnp.bfloat16),
        "b_img": params["b_img"][None, :].astype(jnp.float32),
        "w_pts": params["w_pts"].astype(jnp.bfloat16),
        "b_pts": params["b_pts"][None, :].astype(jnp.float32),
        "w2": w2.astype(jnp.bfloat16),
        "b2": b2[None, :],
        "mid_channels": Cm,
        "out_channels": Co,
        "depth_channels": Cd,
    }


def point_align_pallas(img_pt, pts, packed, *, tile=1024):
    """img_pt: (P, Ci) sampled image feats, pts: (P, Cp) voxel feats (f32)."""
    P, Ci = img_pt.shape
    Cp = pts.shape[1]
    Cm = packed["mid_channels"]
    Co = packed["out_channels"]
    Cd = packed["depth_channels"]
    Cy = FEAT_PAD + DEPTH_PAD

    tile = min(tile, _round_up(P, 16))
    P_pad = _round_up(P, tile)
    if P_pad != P:
        img_pt = jnp.pad(img_pt, ((0, P_pad - P), (0, 0)))
        pts = jnp.pad(pts, ((0, P_pad - P), (0, 0)))

    feat_pad, prob_pad = pl.pallas_call(
        point_align_kernel,
        out_shape=(jax.ShapeDtypeStruct((P_pad, FEAT_PAD), jnp.float32),
                   jax.ShapeDtypeStruct((P_pad, DEPTH_PAD), jnp.float32)),
        grid=(P_pad // tile,),
        in_specs=[
            pl.BlockSpec((tile, Ci), lambda i: (i, 0)),
            pl.BlockSpec((tile, Cp), lambda i: (i, 0)),
            pl.BlockSpec((Ci, Cm), lambda i: (0, 0)),
            pl.BlockSpec((1, Cm), lambda i: (0, 0)),
            pl.BlockSpec((Cp, Cm), lambda i: (0, 0)),
            pl.BlockSpec((1, Cm), lambda i: (0, 0)),
            pl.BlockSpec((Cm, Cy), lambda i: (0, 0)),
            pl.BlockSpec((1, Cy), lambda i: (0, 0)),
        ],
        out_specs=(pl.BlockSpec((tile, FEAT_PAD), lambda i: (i, 0)),
                   pl.BlockSpec((tile, DEPTH_PAD), lambda i: (i, 0))),
        compiler_params=pltpu.CompilerParams(
            dimension_semantics=("parallel",)),
    )(img_pt, pts, packed["w_img"], packed["b_img"],
      packed["w_pts"], packed["b_pts"], packed["w2"], packed["b2"])

    # drop zero pad lanes / zero-probability pad bins
    return feat_pad[:P, :Co], prob_pad[:P, :Cd]


# -----------------------------------------------------------------------------
# Pallas kernel 2: depth refinement (p1 / p1 normalize, merge, p2 normalize)
# operates directly on NCHW-contiguous (B, D, H*W): D on sublanes, pixels on
# lanes -> no full-volume transposes in glue.
# -----------------------------------------------------------------------------
def depth_refine_kernel(img_ref, pts_ref, out_ref):
    eps = 1e-12   # torch F.normalize default; x / max(norm, eps)
    img = img_ref[...]                                   # (1, D, tile_hw) f32
    pts = pts_ref[...]
    # img_depth_norm = 'p1'
    img_n = img / jnp.maximum(jnp.sum(jnp.abs(img), axis=1, keepdims=True), eps)
    # pts_depth_norm = 'p1'
    pts_n = pts / jnp.maximum(jnp.sum(jnp.abs(pts), axis=1, keepdims=True), eps)
    merged = img_n + pts_n
    # merge_depth_norm = 'p2'
    out_ref[...] = merged / jnp.maximum(
        jnp.sqrt(jnp.sum(merged * merged, axis=1, keepdims=True)), eps)


def depth_refine_pallas(img_depth, pts_depth, *, target_tile_hw=4096):
    """img_depth / pts_depth: (B, D, H*W) float32 (NCHW-contiguous).

    Fixed 128-aligned pixel tile with a pl.cdiv grid (ragged last block is
    handled by Pallas; the per-pixel D-axis normalizations are unaffected by
    garbage pad lanes, which are masked on writeback).  4096-pixel tiles keep
    the 6 pipeline buffers (~10 MiB) within the default scoped VMEM on every
    generation; raise toward 8192 on v7x if vmem_limit_bytes is also raised.
    """
    B, D, HW = img_depth.shape
    tile_hw = HW if HW <= target_tile_hw else target_tile_hw  # target is 128-aligned
    spec = pl.BlockSpec((1, D, tile_hw), lambda b, j: (b, 0, j))
    return pl.pallas_call(
        depth_refine_kernel,
        out_shape=jax.ShapeDtypeStruct((B, D, HW), jnp.float32),
        grid=(B, pl.cdiv(HW, tile_hw)),
        in_specs=[spec, spec],
        out_specs=spec,
        compiler_params=pltpu.CompilerParams(
            dimension_semantics=("parallel", "parallel")),
    )(img_depth, pts_depth)


# -----------------------------------------------------------------------------
# JAX glue: projection, bilinear sampling, scatter to image plane
# -----------------------------------------------------------------------------
def project_to_image(centroids, lidar2img):
    """centroids (P,3), lidar2img (4,4) -> u, v, depth each (P,)."""
    P = centroids.shape[0]
    pts_h = jnp.concatenate([centroids, jnp.ones((P, 1), centroids.dtype)], -1)
    proj = pts_h @ lidar2img.T                      # (P,4): (u*d, v*d, d, 1)
    d = proj[:, 2]
    u = proj[:, 0] / jnp.maximum(d, 1e-5)
    v = proj[:, 1] / jnp.maximum(d, 1e-5)
    return u, v, d


def bilinear_sample(img_hwc, u, v, valid):
    """img_hwc (H,W,C); u,v (P,) pixel coords -> (P,C)."""
    H, W, _ = img_hwc.shape
    u = jnp.clip(u, 0.0, W - 1.0)
    v = jnp.clip(v, 0.0, H - 1.0)
    u0 = jnp.floor(u).astype(jnp.int32)
    v0 = jnp.floor(v).astype(jnp.int32)
    u1 = jnp.minimum(u0 + 1, W - 1)
    v1 = jnp.minimum(v0 + 1, H - 1)
    du = (u - u0.astype(u.dtype))[:, None]
    dv = (v - v0.astype(v.dtype))[:, None]
    f00 = img_hwc[v0, u0]
    f01 = img_hwc[v0, u1]
    f10 = img_hwc[v1, u0]
    f11 = img_hwc[v1, u1]
    f = (f00 * (1 - du) * (1 - dv) + f01 * du * (1 - dv)
         + f10 * (1 - du) * dv + f11 * du * dv)
    return jnp.where(valid[:, None], f, 0.0)


def bi_fusion_forward(packed_params, img_feats, voxel_feats, depth_feats,
                      voxel_coords, voxel_centroids, img_metas,
                      voxel_size, point_cloud_range):
    """
    img_feats        : (B, C_img, H, W)   NCHW
    voxel_feats      : (B, N, C_pts)
    depth_feats      : (B, D, H, W)       NCHW depth-bin feats
    voxel_coords     : (B*N, 4)  (batch_idx, z, y, x)
    voxel_centroids  : (B*N, 3)  lidar-frame xyz
    img_metas        : list of dicts with 'lidar2img' (4,4)
    returns: sample_img_feats (B, N, C_out), updated_depth_feats (B, D, H, W)
    """
    B, C_img, H, W = img_feats.shape
    _, N, C_pts = voxel_feats.shape
    D = depth_feats.shape[1]
    pcr = jnp.asarray(point_cloud_range, jnp.float32)

    # ---- per-point camera projection + bilinear image-feature sampling (glue)
    img_hwc = jnp.transpose(img_feats, (0, 2, 3, 1))           # (B,H,W,C_img)
    batch_idx = voxel_coords[:, 0].astype(jnp.int32)           # (B*N,)
    lidar2img = jnp.stack(
        [jnp.asarray(m["lidar2img"], jnp.float32) for m in img_metas], 0)

    sampled, us, vs, valids = [], [], [], []
    for b in range(B):
        sel = slice(b * N, (b + 1) * N)
        cent = voxel_centroids[sel]
        u, v, d = project_to_image(cent, lidar2img[b])
        in_range = jnp.all((cent >= pcr[:3]) & (cent <= pcr[3:]), axis=-1)
        valid = (d > 0.1) & (u >= 0) & (u <= W - 1) & (v >= 0) & (v <= H - 1) \
            & in_range
        sampled.append(bilinear_sample(img_hwc[b], u, v, valid))
        us.append(u); vs.append(v); valids.append(valid)
    sampled_img = jnp.concatenate(sampled, 0)                  # (B*N, C_img)
    u_all = jnp.concatenate(us, 0)
    v_all = jnp.concatenate(vs, 0)
    valid_all = jnp.concatenate(valids, 0)

    pts_flat = voxel_feats.reshape(B * N, C_pts)

    # ---- Pallas hot path 1: fused MLP + per-point depth distribution
    feat_flat, point2depth = point_align_pallas(sampled_img, pts_flat,
                                                packed_params)
    sample_img_feats = feat_flat.reshape(B, N, -1)

    # ---- scatter per-point depth distributions directly into NCHW layout
    ui = jnp.clip(jnp.round(u_all).astype(jnp.int32), 0, W - 1)
    vi = jnp.clip(jnp.round(v_all).astype(jnp.int32), 0, H - 1)
    flat_pix = vi * W + ui
    vals = point2depth * valid_all[:, None].astype(jnp.float32)
    pts_depth_map = jnp.zeros((B, D, H * W), jnp.float32)
    pts_depth_map = pts_depth_map.at[batch_idx, :, flat_pix].add(vals)

    # ---- Pallas hot path 2: depth refinement (no NCHW<->NHWC transposes)
    img_depth = depth_feats.reshape(B, D, H * W)               # free reshape
    refined = depth_refine_pallas(img_depth, pts_depth_map)
    updated_depth_feats = refined.reshape(B, D, H, W)          # free reshape

    return sample_img_feats, updated_depth_feats


# -----------------------------------------------------------------------------
# deterministic parameter init (shapes from point_align_config defaults)
# -----------------------------------------------------------------------------
def init_params(key, img_channels=256, pts_channels=64, mid_channels=64,
                out_channels=64, depth_channels=100):
    ks = jax.random.split(key, 4)
    def lin(k, cin, cout):
        return 0.05 * jax.random.normal(k, (cin, cout), jnp.float32)
    return {
        "w_img": lin(ks[0], img_channels, mid_channels),
        "b_img": jnp.zeros((mid_channels,), jnp.float32),
        "w_pts": lin(ks[1], pts_channels, mid_channels),
        "b_pts": jnp.zeros((mid_channels,), jnp.float32),
        "w_out": lin(ks[2], mid_channels, out_channels),
        "b_out": jnp.zeros((out_channels,), jnp.float32),
        "w_dep": lin(ks[3], mid_channels, depth_channels),
        "b_dep": jnp.zeros((depth_channels,), jnp.float32),
    }


if __name__ == "__main__":
    key = jax.random.PRNGKey(0)
    k0, k1, k2, k3, kp = jax.random.split(key, 5)

    B, N = 2, 64
    C_img, C_pts, D = 256, 64, 100
    H = W = 16

    voxel_size = [0.05, 0.05, 0.1]
    point_cloud_range = [0.0, -40.0, -3.0, 70.4, 40.0, 1.0]

    img_feats = jax.random.normal(k0, (B, C_img, H, W), jnp.float32)
    voxel_feats = jax.random.normal(k1, (B, N, C_pts), jnp.float32)
    depth_feats = jax.random.normal(k2, (B, D, H, W), jnp.float32)

    # voxel centroids: points in front of a forward-looking camera
    cent = jax.random.uniform(k3, (B * N, 3), jnp.float32)
    voxel_centroids = jnp.stack([
        2.0 + 30.0 * cent[:, 0],     # x in [2, 32]
        -5.0 + 10.0 * cent[:, 1],    # y in [-5, 5]
        -1.0 + 2.0 * cent[:, 2],     # z in [-1, 1]
    ], axis=-1)

    batch_idx = jnp.repeat(jnp.arange(B, dtype=jnp.int32), N)
    vs = jnp.asarray(voxel_size, jnp.float32)
    pcr = jnp.asarray(point_cloud_range, jnp.float32)
    zyx = jnp.flip(((voxel_centroids - pcr[:3]) / vs).astype(jnp.int32), -1)
    voxel_coords = jnp.concatenate([batch_idx[:, None], zyx], axis=-1)

    # simple pinhole looking along +x; lidar2img = K @ extrinsic (4x4)
    fx = fy = 10.0
    cx, cy = (W - 1) / 2.0, (H - 1) / 2.0
    K = jnp.array([[fx, 0.0, cx, 0.0],
                   [0.0, fy, cy, 0.0],
                   [0.0, 0.0, 1.0, 0.0],
                   [0.0, 0.0, 0.0, 1.0]], jnp.float32)
    # lidar (x fwd, y left, z up) -> cam (X right, Y down, Z fwd)
    E = jnp.array([[0.0, -1.0, 0.0, 0.0],
                   [0.0, 0.0, -1.0, 0.0],
                   [1.0, 0.0, 0.0, 0.0],
                   [0.0, 0.0, 0.0, 1.0]], jnp.float32)
    lidar2img = K @ E
    img_metas = [{"lidar2img": lidar2img} for _ in range(B)]

    # one-time parameter prep (packing + bf16 cast hoisted out of forward)
    params = init_params(kp, C_img, C_pts, 64, 64, D)
    packed_params = pack_point_align_params(params)

    sample_img_feats, updated_depth_feats = bi_fusion_forward(
        packed_params, img_feats, voxel_feats, depth_feats,
        voxel_coords, voxel_centroids, img_metas,
        voxel_size, point_cloud_range)

    jax.block_until_ready((sample_img_feats, updated_depth_feats))
    assert sample_img_feats.shape == (B, N, 64)
    assert updated_depth_feats.shape == (B, D, H, W)
    assert bool(jnp.all(jnp.isfinite(sample_img_feats)))
    assert bool(jnp.all(jnp.isfinite(updated_depth_feats)))
    print("KERNEL_OK")
</pallas_src>

<mosaic_0001>
module attributes {stable_mosaic.version = 11 : i64} {
  func.func @point_align_kernel(%arg0: i32, %arg1: memref<128x256xf32, #tpu.memory_space<vmem>>, %arg2: memref<128x64xf32, #tpu.memory_space<vmem>>, %arg3: memref<256x64xbf16, #tpu.memory_space<vmem>>, %arg4: memref<1x64xf32, #tpu.memory_space<vmem>>, %arg5: memref<64x64xbf16, #tpu.memory_space<vmem>>, %arg6: memref<1x64xf32, #tpu.memory_space<vmem>>, %arg7: memref<64x256xbf16, #tpu.memory_space<vmem>>, %arg8: memref<1x256xf32, #tpu.memory_space<vmem>>, %arg9: memref<128x128xf32, #tpu.memory_space<vmem>>, %arg10: memref<128x128xf32, #tpu.memory_space<vmem>>) attributes {dimension_semantics = [#tpu.dimension_semantics<parallel>], iteration_bounds = array<i64: 1>, scalar_prefetch = 0 : i64, scratch_operands = 0 : i64, tpu.core_type = #tpu.core_type<tc>, window_params = [{transform_indices = @transform_0, window_bounds = array<i64: 128, 256>}, {transform_indices = @transform_1, window_bounds = array<i64: 128, 64>}, {pipeline_mode = #tpu.pipeline_mode<synchronous>, transform_indices = @transform_2, window_bounds = array<i64: 256, 64>}, {pipeline_mode = #tpu.pipeline_mode<synchronous>, transform_indices = @transform_3, window_bounds = array<i64: 1, 64>}, {pipeline_mode = #tpu.pipeline_mode<synchronous>, transform_indices = @transform_4, window_bounds = array<i64: 64, 64>}, {pipeline_mode = #tpu.pipeline_mode<synchronous>, transform_indices = @transform_5, window_bounds = array<i64: 1, 64>}, {pipeline_mode = #tpu.pipeline_mode<synchronous>, transform_indices = @transform_6, window_bounds = array<i64: 64, 256>}, {pipeline_mode = #tpu.pipeline_mode<synchronous>, transform_indices = @transform_7, window_bounds = array<i64: 1, 256>}, {transform_indices = @transform_8, window_bounds = array<i64: 128, 128>}, {transform_indices = @transform_9, window_bounds = array<i64: 128, 128>}]} {
    %c0 = arith.constant 0 : index
    %c0_0 = arith.constant 0 : index
    %0 = vector.load %arg1[%c0, %c0_0] : memref<128x256xf32, #tpu.memory_space<vmem>>, vector<128x256xf32>
    %1 = arith.truncf %0 : vector<128x256xf32> to vector<128x256xbf16>
    %c0_1 = arith.constant 0 : index
    %c0_2 = arith.constant 0 : index
    %2 = vector.load %arg3[%c0_1, %c0_2] : memref<256x64xbf16, #tpu.memory_space<vmem>>, vector<256x64xbf16>
    %cst = arith.constant dense<0.000000e+00> : vector<128x64xf32>
    %3 = tpu.matmul %1, %2, %cst {dimension_numbers = #tpu.dot_dimension_numbers<[1], [0], [0], [1], [0, 0, 1, 1], [], []>} : vector<128x256xbf16>, vector<256x64xbf16>, vector<128x64xf32> -> vector<128x64xf32>
    %c0_3 = arith.constant 0 : index
    %c0_4 = arith.constant 0 : index
    %4 = vector.load %arg4[%c0_3, %c0_4] : memref<1x64xf32, #tpu.memory_space<vmem>>, vector<1x64xf32>
    %5 = vector.broadcast %4 : vector<1x64xf32> to vector<128x64xf32>
    %6 = arith.addf %3, %5 : vector<128x64xf32>
    %cst_5 = arith.constant 0.000000e+00 : f32
    %7 = vector.broadcast %cst_5 : f32 to vector<128x64xf32>
    %8 = arith.maximumf %6, %7 : vector<128x64xf32>
    %c0_6 = arith.constant 0 : index
    %c0_7 = arith.constant 0 : index
    %9 = vector.load %arg2[%c0_6, %c0_7] : memref<128x64xf32, #tpu.memory_space<vmem>>, vector<128x64xf32>
    %10 = arith.truncf %9 : vector<128x64xf32> to vector<128x64xbf16>
    %c0_8 = arith.constant 0 : index
    %c0_9 = arith.constant 0 : index
    %11 = vector.load %arg5[%c0_8, %c0_9] : memref<64x64xbf16, #tpu.memory_space<vmem>>, vector<64x64xbf16>
    %cst_10 = arith.constant dense<0.000000e+00> : vector<128x64xf32>
    %12 = tpu.matmul %10, %11, %cst_10 {dimension_numbers = #tpu.dot_dimension_numbers<[1], [0], [0], [1], [0, 0, 1, 1], [], []>} : vector<128x64xbf16>, vector<64x64xbf16>, vector<128x64xf32> -> vector<128x64xf32>
    %c0_11 = arith.constant 0 : index
    %c0_12 = arith.constant 0 : index
    %13 = vector.load %arg6[%c0_11, %c0_12] : memref<1x64xf32, #tpu.memory_space<vmem>>, vector<1x64xf32>
    %14 = vector.broadcast %13 : vector<1x64xf32> to vector<128x64xf32>
    %15 = arith.addf %12, %14 : vector<128x64xf32>
    %cst_13 = arith.constant 0.000000e+00 : f32
    %16 = vector.broadcast %cst_13 : f32 to vector<128x64xf32>
    %17 = arith.maximumf %15, %16 : vector<128x64xf32>
    %18 = arith.addf %8, %17 : vector<128x64xf32>
    %19 = arith.truncf %18 : vector<128x64xf32> to vector<128x64xbf16>
    %c0_14 = arith.constant 0 : index
    %c0_15 = arith.constant 0 : index
    %20 = vector.load %arg7[%c0_14, %c0_15] : memref<64x256xbf16, #tpu.memory_space<vmem>>, vector<64x256xbf16>
    %cst_16 = arith.constant dense<0.000000e+00> : vector<128x256xf32>
    %21 = tpu.matmul %19, %20, %cst_16 {dimension_numbers = #tpu.dot_dimension_numbers<[1], [0], [0], [1], [0, 0, 1, 1], [], []>} : vector<128x64xbf16>, vector<64x256xbf16>, vector<128x256xf32> -> vector<128x256xf32>
    %c0_17 = arith.constant 0 : index
    %c0_18 = arith.constant 0 : index
    %22 = vector.load %arg8[%c0_17, %c0_18] : memref<1x256xf32, #tpu.memory_space<vmem>>, vector<1x256xf32>
    %23 = vector.broadcast %22 : vector<1x256xf32> to vector<128x256xf32>
    %24 = arith.addf %21, %23 : vector<128x256xf32>
    %25 = vector.extract_strided_slice %24 {offsets = [0, 0], sizes = [128, 128], strides = [1, 1]} : vector<128x256xf32> to vector<128x128xf32>
    %cst_19 = arith.constant 0.000000e+00 : f32
    %26 = vector.broadcast %cst_19 : f32 to vector<128x128xf32>
    %27 = arith.maximumf %25, %26 : vector<128x128xf32>
    %c0_20 = arith.constant 0 : index
    %c0_21 = arith.constant 0 : index
    %28 = vector.load %arg9[%c0_20, %c0_21] : memref<128x128xf32, #tpu.memory_space<vmem>>, vector<128x128xf32>
    tpu.vector_store %arg9[%c0_20, %c0_21], %27 {strides = array<i32>} : memref<128x128xf32, #tpu.memory_space<vmem>>, vector<128x128xf32>,
    %29 = vector.extract_strided_slice %24 {offsets = [0, 128], sizes = [128, 128], strides = [1, 1]} : vector<128x256xf32> to vector<128x128xf32>
    %cst_22 = arith.constant dense<0xFF800000> : vector<128xf32>
    %30 = vector.multi_reduction <maximumf>, %29, %cst_22 [1] : vector<128x128xf32> to vector<128xf32>
    %31 = vector.shape_cast %30 : vector<128xf32> to vector<128x1xf32>
    %32 = vector.broadcast %31 : vector<128x1xf32> to vector<128x128xf32>
    %33 = arith.subf %29, %32 : vector<128x128xf32>
    %34 = math.exp %33 : vector<128x128xf32>
    %cst_23 = arith.constant dense<0.000000e+00> : vector<128xf32>
    %35 = vector.multi_reduction <add>, %34, %cst_23 [1] : vector<128x128xf32> to vector<128xf32>
    %36 = vector.shape_cast %35 : vector<128xf32> to vector<128x1xf32>
    %37 = vector.broadcast %36 : vector<128x1xf32> to vector<128x128xf32>
    %38 = arith.divf %34, %37 : vector<128x128xf32>
    %c0_24 = arith.constant 0 : index
    %c0_25 = arith.constant 0 : index
    %39 = vector.load %arg10[%c0_24, %c0_25] : memref<128x128xf32, #tpu.memory_space<vmem>>, vector<128x128xf32>
    tpu.vector_store %arg10[%c0_24, %c0_25], %38 {strides = array<i32>} : memref<128x128xf32, #tpu.memory_space<vmem>>, vector<128x128xf32>,
    return
  }
  func.func @transform_0(%arg0: i32) -> (i32, i32) {
    %c0_i32 = arith.constant 0 : i32
    %c0_i32_0 = arith.constant 0 : i32
    return %arg0, %c0_i32 : i32, i32
  }
  func.func @transform_1(%arg0: i32) -> (i32, i32) {
    %c0_i32 = arith.constant 0 : i32
    %c0_i32_0 = arith.constant 0 : i32
    return %arg0, %c0_i32 : i32, i32
  }
  func.func @transform_2(%arg0: i32) -> (i32, i32) {
    %c0_i32 = arith.constant 0 : i32
    %c0_i32_0 = arith.constant 0 : i32
    %c0_i32_1 = arith.constant 0 : i32
    return %c0_i32, %c0_i32_0 : i32, i32
  }
  func.func @transform_3(%arg0: i32) -> (i32, i32) {
    %c0_i32 = arith.constant 0 : i32
    %c0_i32_0 = arith.constant 0 : i32
    %c0_i32_1 = arith.constant 0 : i32
    return %c0_i32, %c0_i32_0 : i32, i32
  }
  func.func @transform_4(%arg0: i32) -> (i32, i32) {
    %c0_i32 = arith.constant 0 : i32
    %c0_i32_0 = arith.constant 0 : i32
    %c0_i32_1 = arith.constant 0 : i32
    return %c0_i32, %c0_i32_0 : i32, i32
  }
  func.func @transform_5(%arg0: i32) -> (i32, i32) {
    %c0_i32 = arith.constant 0 : i32
    %c0_i32_0 = arith.constant 0 : i32
    %c0_i32_1 = arith.constant 0 : i32
    return %c0_i32, %c0_i32_0 : i32, i32
  }
  func.func @transform_6(%arg0: i32) -> (i32, i32) {
    %c0_i32 = arith.constant 0 : i32
    %c0_i32_0 = arith.constant 0 : i32
    %c0_i32_1 = arith.constant 0 : i32
    return %c0_i32, %c0_i32_0 : i32, i32
  }
  func.func @transform_7(%arg0: i32) -> (i32, i32) {
    %c0_i32 = arith.constant 0 : i32
    %c0_i32_0 = arith.constant 0 : i32
    %c0_i32_1 = arith.constant 0 : i32
    return %c0_i32, %c0_i32_0 : i32, i32
  }
  func.func @transform_8(%arg0: i32) -> (i32, i32) {
    %c0_i32 = arith.constant 0 : i32
    %c0_i32_0 = arith.constant 0 : i32
    return %arg0, %c0_i32 : i32, i32
  }
  func.func @transform_9(%arg0: i32) -> (i32, i32) {
    %c0_i32 = arith.constant 0 : i32
    %c0_i32_0 = arith.constant 0 : i32
    return %arg0, %c0_i32 : i32, i32
  }
}

</mosaic_0001>

<bundles_post_ra>
// kernel: tpu_custom_call.1
= control target key start
LH: loop header
LB: loop body
LE: loop exit
PB: predicated region body
PF: predicated region fallthrough
CT: control target
= control target key end

     0   :  { %15 = vsyncpa [#allocation3], 0  ;;  %s1930_s0 = inlined_call_operand.vmem [shape: f32[128,256], index: 0, kind: input, shape index: {}]   ;;  %s1931_s1 = inlined_call_operand.vmem [shape: f32[128,64], index: 1, kind: input, shape index: {}]   ;;  %s1932_s2 = inlined_call_operand.vmem [shape: bf16[256,64], index: 2, kind: input, shape index: {}]   ;;  %s1933_s3 = inlined_call_operand.vmem [shape: f32[1,64], index: 3, kind: input, shape index: {}]   ;;  %s1934_s4 = inlined_call_operand.hbm [shape: bf16[64,64], index: 4, kind: input, shape index: {}]   ;;  %s1935_s5 = inlined_call_operand.vmem [shape: f32[1,64], index: 5, kind: input, shape index: {}]   ;;  %s1936_s6 = inlined_call_operand.vmem [shape: bf16[64,256], index: 6, kind: input, shape index: {}]   ;;  %s1937_s7 = inlined_call_operand.vmem [shape: f32[1,256], index: 7, kind: input, shape index: {}]   ;;  %s1938_s8 = inlined_call_operand.hbm [shape: f32[128,128], index: 8, kind: output, shape index: {0}]   ;;  %s1939_s9 = inlined_call_operand.hbm [shape: f32[128,128], index: 9, kind: output, shape index: {1}]  }
   0x1   :  { %16 = vsyncpa [#allocation4], 0 }
   0x2   :  { %17 = vsyncpa [#allocation7], 0  ;;  %s1321_s30 = smov [#allocation2]   ;;  %s1249_s13 = scalar_lea.hbm %s1934_s4, 512 }
   0x3   :  { %s31_s10 = sshll.u32 %s1321_s30, 4  ;;  %p1250_p0 = scmp.ne.s32.totalorder %s1934_s4, %s1249_s13  ;;  %s32_s10 = int_to_ptr.vmem [resolvable:$true] %s31_s10 }
   0x4   :  { %p1253_p1 = scmp.lt.u32.totalorder %s1249_s13, %s1934_s4 }
   0x6   :  { %p1255_p2 = pnand %p1253_p1, %p1250_p0 }
   0x8   :  { %1258 = shalt.err (!%p1255_p2)
}
   0x9   :  { %s1259_s18 = scalar_lea.vmem %s32_s10, 512  ;;  %p1264_p4 = scmp.lt.s32.totalorder %s32_s10, %s32_s10 }
   0xa   :  { %p1260_p3 = scmp.ne.s32.totalorder %s32_s10, %s1259_s18  ;;  %p1265_p5 = scmp.lt.s32.totalorder %s1259_s18, %s1259_s18 }
   0xc   :  { %p1266_p6 = por %p1265_p5, %p1264_p4 }
   0xe   :  { %p1267_p7 = pnand %p1266_p6, %p1260_p3 }
  0x10   :  { %1270 = shalt.err (!%p1267_p7)
}
  0x11   :  { %s1322_s19 = smov 64   ;;  %s1323_s20 = smov 4  }
  0x12   :  { %37 = dma.hbm_to_vmem [thread:$0]  %s1934_s4, 512, %s32_s10, [#allocation3], %s1322_s19, %s1322_s19, %s1323_s20  }
  0x13   :  { %1315 = dma.done.wait [#allocation3], 512  }
  0x14   :  { %1316 = vsyncadd [#allocation3], 4294966784  ;;  %v1153_v0 = vld [vmem:[%s1932_s2 + $0x40] sm:$0xff]   ;;  %v1155_v2 = vld [vmem:[%s1932_s2 + $0x48] sm:$0xff]   ;;  %vm407_vm0 = vcmask 523264  }
  0x15   :  { %v1154_v1 = vld [vmem:[%s1932_s2] sm:$0xff]   ;;  %1037 = vmatprep.subr.bf16.mxu0 %v1153_v0  ;;  %v1156_v3 = vld [vmem:[%s1932_s2 + $0x8] sm:$0xff]   ;;  %v1157_v4 = vld [vmem:[%s1932_s2 + $0x50] sm:$0xff]  }
  0x16   :  { %1038 = vmatpush3.bf16.msra.mxu0 %v1154_v1  ;;  %v1158_v5 = vld [vmem:[%s1932_s2 + $0x10] sm:$0xff]   ;;  %v1159_v6 = vld [vmem:[%s1932_s2 + $0x58] sm:$0xff]   ;;  %v1161_v8 = vld [vmem:[%s1932_s2 + $0x60] sm:$0xff]  }
  0x17   :  { %1039 = vmatprep.subr.bf16.mxu0 %v1155_v2  ;;  %v1160_v7 = vld [vmem:[%s1932_s2 + $0x18] sm:$0xff]   ;;  %v1162_v9 = vld [vmem:[%s1932_s2 + $0x20] sm:$0xff]   ;;  %v1163_v10 = vld [vmem:[%s1932_s2 + $0x68] sm:$0xff]  }
  0x18   :  { %v49_v11 = vld [vmem:[%s1930_s0 + $0x8] sm:$0xff]  ;;  %v51_v12 = vld [vmem:[%s1930_s0 + $0x18] sm:$0xff]  ;;  %v1169_v14 = vld [vmem:[#allocation2] sm:$0xff]  }
  0x19   :  { %v81_v13 = vpack.c.bf16 %v51_v12, %v49_v11  ;;  %v1164_v15 = vld [vmem:[%s1932_s2 + $0x28] sm:$0xff]   ;;  %v1165_v17 = vld [vmem:[%s1932_s2 + $0x70] sm:$0xff]   ;;  %1137 = vmatprep.subr.bf16.mxu1 %v1169_v14  ;;  %v1167_v20 = vld [vmem:[%s1932_s2 + $0x78] sm:$0xff]  }
  0x1a   :  { %1040 = vmatpush3.bf16.msra.mxu0 %v1156_v3  ;;  %v1170_v16 = vld [vmem:[#allocation2 + $0x8] sm:$0xff]   ;;  %1141 = vmatpush3.bf16.msra.mxu1 %v1169_v14  ;;  %v1171_v18 = vld [vmem:[#allocation2 + $0x10] sm:$0xff]   ;;  %v348_v21 = vld [vmem:[%s1931_s1 + $0x20] sm:$0xff] }
  0x1b   :  { %1041 = vmatprep.subr.bf16.mxu0 %v1157_v4  ;;  %263 = vmatprep.mubr.bf16.mxu0 %v81_v13  ;;  %v1166_v19 = vld [vmem:[%s1932_s2 + $0x30] sm:$0xff]   ;;  %v349_v22 = vld [vmem:[%s1931_s1 + $0x28] sm:$0xff]  ;;  %v1172_v24 = vld [vmem:[#allocation2 + $0x18] sm:$0xff]  }
  0x1c   :  { %1138 = vmatprep.subr.bf16.mxu1 %v1170_v16  ;;  %v362_v23 = vpack.c.bf16 %v349_v22, %v348_v21  ;;  %v1168_v25 = vld [vmem:[%s1932_s2 + $0x38] sm:$0xff]   ;;  %v48_v26 = vld [vmem:[%s1930_s0] sm:$0xff]  ;;  %v50_v27 = vld [vmem:[%s1930_s0 + $0x10] sm:$0xff] }
  0x1d   :  { %v53_v28 = vld [vmem:[%s1930_s0 + $0x28] sm:$0xff]  ;;  %v55_v29 = vld [vmem:[%s1930_s0 + $0x38] sm:$0xff]  ;;  %v350_v30 = vld [vmem:[%s1931_s1 + $0x30] sm:$0xff]  ;;  %v80_v32 = vpack.c.bf16 %v50_v27, %v48_v26 }
  0x1e   :  { %1042 = vmatpush3.bf16.msra.mxu0 %v1158_v5  ;;  %1142 = vmatpush3.bf16.msra.mxu1 %v1170_v16  ;;  %v351_v31 = vld [vmem:[%s1931_s1 + $0x38] sm:$0xff]  ;;  %v352_v33 = vld [vmem:[%s1931_s1 + $0x40] sm:$0xff]  ;;  %v353_v34 = vld [vmem:[%s1931_s1 + $0x48] sm:$0xff]  ;;  %v83_v35 = vpack.c.bf16 %v55_v29, %v53_v28 }
  0x1f   :  { %1043 = vmatprep.subr.bf16.mxu0 %v1159_v6  ;;  %1139 = vmatprep.subr.bf16.mxu1 %v1171_v18  ;;  %v363_v36 = vpack.c.bf16 %v351_v31, %v350_v30  ;;  %v364_v37 = vpack.c.bf16 %v353_v34, %v352_v33  ;;  %v52_v38 = vld [vmem:[%s1930_s0 + $0x20] sm:$0xff]  ;;  %v54_v39 = vld [vmem:[%s1930_s0 + $0x30] sm:$0xff]  ;;  %v57_v40 = vld [vmem:[%s1930_s0 + $0x48] sm:$0xff] }
  0x20   :  { %1125 = vmatprep.mubr.msk.bf16.mxu1 %vm407_vm0, %v362_v23  ;;  %v59_v41 = vld [vmem:[%s1930_s0 + $0x58] sm:$0xff]  ;;  %v354_v42 = vld [vmem:[%s1931_s1 + $0x50] sm:$0xff]  ;;  %v356_v44 = vld [vmem:[%s1931_s1 + $0x60] sm:$0xff]  ;;  %v82_v45 = vpack.c.bf16 %v54_v39, %v52_v38 }
  0x21   :  { %v355_v43 = vld [vmem:[%s1931_s1 + $0x58] sm:$0xff]  ;;  %v357_v46 = vld [vmem:[%s1931_s1 + $0x68] sm:$0xff]  ;;  %v85_v47 = vpack.c.bf16 %v59_v41, %v57_v40  ;;  %v56_v50 = vld [vmem:[%s1930_s0 + $0x40] sm:$0xff] }
  0x22   :  { %1044 = vmatpush3.bf16.msra.mxu0 %v1160_v7  ;;  %1143 = vmatpush3.bf16.msra.mxu1 %v1171_v18  ;;  %v365_v48 = vpack.c.bf16 %v355_v43, %v354_v42  ;;  %v366_v49 = vpack.c.bf16 %v357_v46, %v356_v44  ;;  %v58_v51 = vld [vmem:[%s1930_s0 + $0x50] sm:$0xff]  ;;  %v61_v52 = vld [vmem:[%s1930_s0 + $0x68] sm:$0xff]  ;;  %v63_v53 = vld [vmem:[%s1930_s0 + $0x78] sm:$0xff] }
  0x23   :  { %1045 = vmatprep.subr.bf16.mxu0 %v1161_v8  ;;  %1140 = vmatprep.subr.bf16.mxu1 %v1172_v24  ;;  %v358_v54 = vld [vmem:[%s1931_s1 + $0x70] sm:$0xff]  ;;  %v359_v55 = vld [vmem:[%s1931_s1 + $0x78] sm:$0xff]  ;;  %v84_v56 = vpack.c.bf16 %v58_v51, %v56_v50  ;;  %v87_v57 = vpack.c.bf16 %v63_v53, %v61_v52  ;;  %v60_v59 = vld [vmem:[%s1930_s0 + $0x60] sm:$0xff] }
  0x24   :  { %v367_v58 = vpack.c.bf16 %v359_v55, %v358_v54  ;;  %v62_v60 = vld [vmem:[%s1930_s0 + $0x70] sm:$0xff]  ;;  %v65_v61 = vld [vmem:[%s1930_s0 + $0x88] sm:$0xff]  ;;  %v67_v62 = vld [vmem:[%s1930_s0 + $0x98] sm:$0xff] }
  0x25   :  { %v86_v63 = vpack.c.bf16 %v62_v60, %v60_v59  ;;  %v89_v0 = vpack.c.bf16 %v67_v62, %v65_v61  ;;  %v64_v1 = vld [vmem:[%s1930_s0 + $0x80] sm:$0xff]  ;;  %v66_v2 = vld [vmem:[%s1930_s0 + $0x90] sm:$0xff]  ;;  %v69_v3 = vld [vmem:[%s1930_s0 + $0xa8] sm:$0xff] }
  0x26   :  { %1046 = vmatpush3.bf16.msra.mxu0 %v1162_v9  ;;  %1144 = vmatpush3.bf16.msra.mxu1 %v1172_v24  ;;  %v71_v4 = vld [vmem:[%s1930_s0 + $0xb8] sm:$0xff]  ;;  %v88_v5 = vpack.c.bf16 %v66_v2, %v64_v1  ;;  %v68_v7 = vld [vmem:[%s1930_s0 + $0xa0] sm:$0xff]  ;;  %v70_v8 = vld [vmem:[%s1930_s0 + $0xb0] sm:$0xff] }
  0x27   :  { %1047 = vmatprep.subr.bf16.mxu0 %v1163_v10  ;;  %v91_v6 = vpack.c.bf16 %v71_v4, %v69_v3  ;;  %v73_v9 = vld [vmem:[%s1930_s0 + $0xc8] sm:$0xff]  ;;  %v75_v10 = vld [vmem:[%s1930_s0 + $0xd8] sm:$0xff]  ;;  %v90_v11 = vpack.c.bf16 %v70_v8, %v68_v7  ;;  %v72_v13 = vld [vmem:[%s1930_s0 + $0xc0] sm:$0xff] }
  0x28   :  { %v93_v12 = vpack.c.bf16 %v75_v10, %v73_v9  ;;  %v344_v21 = vld [vmem:[%s1931_s1] sm:$0xff]  ;;  %v345_v22 = vld [vmem:[%s1931_s1 + $0x8] sm:$0xff]  ;;  %v347_v26 = vld [vmem:[%s1931_s1 + $0x18] sm:$0xff] }
  0x29   :  { %1126 = vmatmul.mubr.msk.bf16.vlgmr.msra.gmra.mrb[0].mxu1 %vm407_vm0, %v363_v36  ;;  %v1173_v28 = vld [vmem:[%s1936_s6] ss:$8 sps:$4 sm:$0xff]   ;;  %v1175_v29 = vld [vmem:[%s1936_s6 + $0x4] ss:$8 sps:$4 sm:$0xff]   ;;  %v1178_v30 = vld [vmem:[%s1936_s6 + $0x14] ss:$8 sps:$4 sm:$0xff]  }
  0x2a   :  { %1048 = vmatpush3.bf16.msra.mxu0 %v1164_v15  ;;  %1129 = vmatprep.mubr.msk.bf16.mxu1 %vm407_vm0, %v364_v37  ;;  %v77_v15 = vld [vmem:[%s1930_s0 + $0xe8] sm:$0xff]  ;;  %v1176_v31 = vld [vmem:[%s1936_s6 + $0x10] ss:$8 sps:$4 sm:$0xff]   ;;  %v1184_v34 = vld [vmem:[%s1936_s6 + $0x34] ss:$8 sps:$4 sm:$0xff]   ;;  %v1324_v36 = vmov 0  }
  0x2b   :  { %1049 = vmatprep.subr.bf16.mxu0 %v1165_v17  ;;  %653 = vmatprep.subr.bf16.mxu1 %v1175_v29  ;;  %v1179_v33 = vld [vmem:[%s1936_s6 + $0x20] ss:$8 sps:$4 sm:$0xff]  }
  0x2c   :  { %654 = vmatpush1.bf16.msra.mxu1 %v1173_v28  ;;  %v1636_v1 = vld [vmem:[%s1933_s3] ss:$0 sm:$0xff] }
  0x2d   :  { %655 = vmatprep.subr.bf16.mxu1 %v1178_v30 }
  0x2e   :  { %1050 = vmatpush3.bf16.msra.mxu0 %v1166_v19  ;;  %v76_v19 = vld [vmem:[%s1930_s0 + $0xe0] sm:$0xff] }
  0x2f   :  { %1051 = vmatprep.subr.bf16.mxu0 %v1167_v20  ;;  %v78_v20 = vld [vmem:[%s1930_s0 + $0xf0] sm:$0xff] }
  0x30   :  { %v94_v23 = vpack.c.bf16 %v78_v20, %v76_v19  ;;  %656 = vmatpush1.bf16.msra.mxu1 %v1176_v31 }
  0x31   :  { %1130 = vmatmul.mubr.msk.bf16.gmra.mrb[4].mxu1 %vm407_vm0, %v365_v48 }
  0x32   :  { %1052 = vmatpush3.bf16.msra.mxu0 %v1168_v25  ;;  %1133 = vmatprep.mubr.msk.bf16.mxu1 %vm407_vm0, %v366_v49  ;;  %v346_v25 = vld [vmem:[%s1931_s1 + $0x10] sm:$0xff] }
  0x33   :  { %1113 = vmatprep.subr.bf16.mxu0 %v1169_v14  ;;  %v361_v27 = vpack.c.bf16 %v347_v26, %v346_v25 }
  0x35   :  { %264 = vmatmul.mubr.bf16.vlgmr.msra.gmra.mrb[0].mxu0 %v80_v32  ;;  %v1181_v32 = vld [vmem:[%s1936_s6 + $0x24] ss:$8 sps:$4 sm:$0xff]  }
  0x36   :  { %1114 = vmatpush3.bf16.msra.mxu0 %v1169_v14  ;;  %271 = vmatprep.mubr.bf16.mxu0 %v83_v35  ;;  %v74_v14 = vld [vmem:[%s1930_s0 + $0xd0] sm:$0xff] }
  0x37   :  { %1115 = vmatprep.subr.bf16.mxu0 %v1170_v16  ;;  %v92_v17 = vpack.c.bf16 %v74_v14, %v72_v13  ;;  %657 = vmatprep.subr.bf16.mxu1 %v1181_v32  ;;  %v1182_v35 = vld [vmem:[%s1936_s6 + $0x30] ss:$8 sps:$4 sm:$0xff]  }
  0x38   :  { %658 = vmatpush1.bf16.msra.mxu1 %v1179_v33 }
  0x39   :  { %1134 = vmatmul.mubr.msk.bf16.gmra.mrb[8].mxu1 %vm407_vm0, %v367_v58  ;;  %659 = vmatprep.subr.bf16.mxu1 %v1184_v34 }
  0x3a   :  { %1116 = vmatpush3.bf16.msra.mxu0 %v1170_v16  ;;  %v79_v16 = vld [vmem:[%s1930_s0 + $0xf8] sm:$0xff]  ;;  %685 = vmatprep.mubr.bf16.mxu1 %v1324_v36 }
  0x3b   :  { %1117 = vmatprep.subr.bf16.mxu0 %v1171_v18 }
  0x3c   :  { %660 = vmatpush1.bf16.msra.mxu1 %v1182_v35 }
  0x3d   :  { %272 = vmatmul.mubr.bf16.gmra.mrb[4].mxu0 %v82_v45 }
  0x3e   :  { %279 = vmatprep.mubr.bf16.mxu0 %v85_v47  ;;  %1118 = vmatpush3.bf16.msra.mxu0 %v1171_v18  ;;  %v95_v18 = vpack.c.bf16 %v79_v16, %v77_v15 }
  0x3f   :  { %1119 = vmatprep.subr.bf16.mxu0 %v1172_v24 }
  0x42   :  { %1120 = vmatpush3.bf16.msra.mxu0 %v1172_v24  ;;  %v360_v24 = vpack.c.bf16 %v345_v22, %v344_v21 }
  0x45   :  { %280 = vmatmul.mubr.bf16.gmra.mrb[8].mxu0 %v84_v56  ;;  %v1627_v56 = vld [vmem:[%s1935_s5] ss:$0 sm:$0xff] }
  0x46   :  { %287 = vmatprep.mubr.bf16.mxu0 %v87_v57 }
  0x4d   :  { %288 = vmatmul.mubr.bf16.gmra.mrb[12].mxu0 %v86_v63 }
  0x4e   :  { %295 = vmatprep.mubr.bf16.mxu0 %v89_v0 }
  0x55   :  { %296 = vmatmul.mubr.bf16.gmra.mrb[16].mxu0 %v88_v5 }
  0x56   :  { %303 = vmatprep.mubr.bf16.mxu0 %v91_v6 }
  0x5d   :  { %304 = vmatmul.mubr.bf16.gmra.mrb[20].mxu0 %v90_v11 }
  0x5e   :  { %311 = vmatprep.mubr.bf16.mxu0 %v93_v12 }
  0x65   :  { %312 = vmatmul.mubr.bf16.gmra.mrb[24].mxu0 %v92_v17 }
  0x66   :  { %319 = vmatprep.mubr.bf16.mxu0 %v95_v18 }
  0x6d   :  { %320 = vmatmul.mubr.bf16.gmra.mrb[28].mxu0 %v94_v23 }
  0x6e   :  { %1121 = vmatprep.mubr.msk.bf16.mxu0 %vm407_vm0, %v360_v24 }
  0x75   :  { %1122 = vmatmul.mubr.msk.bf16.vlgmr.msra.gmra.mrb[32].mxu0 %vm407_vm0, %v361_v27 }
  0xfc   :  { %v1127_v41 = vpop.f32.mrb[0].mxu1 }
  0xfd   :  { %v482_v43 = vpop.f32.mrb[1].mxu1  ;;  %v491_v12 = vadd.f32 %v1127_v41, %v1627_v56 }
  0xfe   :  { %v1128_v45 = vpop.f32.mrb[2].mxu1  ;;  %v483_v59 = vadd.f32 %v1627_v56, %v482_v43 }
  0xff   :  { %v485_v46 = vpop.f32.mrb[3].mxu1  ;;  %v494_v17 = vadd.f32 %v1128_v45, %v1627_v56  ;;  %v535_v22 = vmax.f32 %v491_v12, 0.0 }
 0x100   :  { %v486_v63 = vadd.f32 %v1627_v56, %v485_v46  ;;  %v533_v6 = vmax.f32 %v483_v59, 0.0 }
 0x101   :  { %v536_v26 = vmax.f32 %v494_v17, 0.0 }
 0x102   :  { %v534_v11 = vmax.f32 %v486_v63, 0.0 }
 0x104   :  { %v1131_v51 = vpop.f32.mrb[4].mxu1 }
 0x105   :  { %v498_v53 = vpop.f32.mrb[5].mxu1 }
 0x106   :  { %v1132_v55 = vpop.f32.mrb[6].mxu1  ;;  %v499_v32 = vadd.f32 %v1627_v56, %v498_v53 }
 0x107   :  { %v501_v57 = vpop.f32.mrb[7].mxu1 }
 0x108   :  { %v1053_v37 = vpop.f32.mrb[0].mxu0  ;;  %v537_v45 = vmax.f32 %v499_v32, 0.0 }
 0x109   :  { %v1054_v38 = vpop.f32.mrb[1].mxu0 }
 0x10a   :  { %v1616_v39 = vadd.f32 %v1054_v38, %v1053_v37  ;;  %v1056_v40 = vpop.f32.mrb[2].mxu0  ;;  %v502_v38 = vadd.f32 %v1627_v56, %v501_v57  ;;  %v510_v57 = vadd.f32 %v1132_v55, %v1627_v56 }
 0x10b   :  { %v1057_v42 = vpop.f32.mrb[3].mxu0 }
 0x10c   :  { %v1618_v44 = vadd.f32 %v1057_v42, %v1056_v40  ;;  %v1631_v0 = vpop.f32.mrb[8].mxu1 }
 0x10d   :  { %v1638_v3 = vpop.f32.mrb[9].mxu1 }
 0x10e   :  { %v1641_v7 = vpop.f32.mrb[10].mxu1 }
 0x10f   :  { %v1643_v8 = vpop.f32.mrb[11].mxu1 }
 0x110   :  { %v1059_v47 = vpop.f32.mrb[4].mxu0 }
 0x111   :  { %v1060_v48 = vpop.f32.mrb[5].mxu0 }
 0x112   :  { %v1620_v49 = vadd.f32 %v1060_v48, %v1059_v47  ;;  %v1062_v50 = vpop.f32.mrb[6].mxu0  ;;  %v538_v48 = vmax.f32 %v502_v38, 0.0 }
 0x113   :  { %v1063_v52 = vpop.f32.mrb[7].mxu0 }
 0x114   :  { %v1622_v54 = vadd.f32 %v1063_v52, %v1062_v50  ;;  %v507_v50 = vadd.f32 %v1131_v51, %v1627_v56  ;;  %v540_v51 = vmax.f32 %v510_v57, 0.0 }
 0x118   :  { %v1065_v58 = vpop.f32.mrb[8].mxu0 }
 0x119   :  { %v1066_v60 = vpop.f32.mrb[9].mxu0 }
 0x11a   :  { %v1067_v61 = vadd.f32 %v1066_v60, %v1065_v58  ;;  %v1068_v62 = vpop.f32.mrb[10].mxu0 }
 0x11b   :  { %v1069_v2 = vpop.f32.mrb[11].mxu0 }
 0x11c   :  { %v282_v4 = vadd.f32 %v1067_v61, %v1636_v1  ;;  %v1070_v5 = vadd.f32 %v1069_v2, %v1068_v62  ;;  %v539_v2 = vmax.f32 %v507_v50, 0.0 }
 0x11e   :  { %v332_v9 = vmax.f32 %v282_v4, 0.0  ;;  %v285_v10 = vadd.f32 %v1070_v5, %v1636_v1 }
 0x120   :  { %v333_v13 = vmax.f32 %v285_v10, 0.0  ;;  %v1647_v14 = vadd.f32 %v533_v6, %v332_v9  ;;  %v1071_v15 = vpop.f32.mrb[12].mxu0 }
 0x121   :  { %v1072_v16 = vpop.f32.mrb[13].mxu0 }
 0x122   :  { %v1650_v18 = vadd.f32 %v534_v11, %v333_v13  ;;  %v1073_v19 = vadd.f32 %v1072_v16, %v1071_v15  ;;  %v1074_v20 = vpop.f32.mrb[14].mxu0  ;;  %v515_v13 = vadd.f32 %v1627_v56, %v1638_v3 }
 0x123   :  { %v1075_v21 = vpop.f32.mrb[15].mxu0 }
 0x124   :  { %v563_v23 = vpack.c.bf16 %v1650_v18, %v1647_v14  ;;  %v290_v24 = vadd.f32 %v1073_v19, %v1636_v1  ;;  %v1076_v25 = vadd.f32 %v1075_v21, %v1074_v20  ;;  %v518_v20 = vadd.f32 %v1627_v56, %v1643_v8 }
 0x125   :  { %v526_v8 = vadd.f32 %v1641_v7, %v1627_v56 }
 0x126   :  { %v334_v27 = vmax.f32 %v290_v24, 0.0  ;;  %v293_v28 = vadd.f32 %v1076_v25, %v1636_v1  ;;  %v542_v3 = vmax.f32 %v518_v20, 0.0 }
 0x128   :  { %v1656_v29 = vadd.f32 %v535_v22, %v334_v27  ;;  %v335_v30 = vmax.f32 %v293_v28, 0.0  ;;  %v1077_v31 = vpop.f32.mrb[16].mxu0 }
 0x129   :  { %v1078_v33 = vpop.f32.mrb[17].mxu0 }
 0x12a   :  { %v1659_v34 = vadd.f32 %v536_v26, %v335_v30  ;;  %v1079_v35 = vadd.f32 %v1078_v33, %v1077_v31  ;;  %v1080_v37 = vpop.f32.mrb[18].mxu0  ;;  %v541_v26 = vmax.f32 %v515_v13, 0.0  ;;  %v523_v30 = vadd.f32 %v1631_v0, %v1627_v56 }
 0x12b   :  { %v1081_v40 = vpop.f32.mrb[19].mxu0 }
 0x12c   :  { %v564_v41 = vpack.c.bf16 %v1659_v34, %v1656_v29  ;;  %v298_v42 = vadd.f32 %v1079_v35, %v1636_v1  ;;  %v1082_v43 = vadd.f32 %v1081_v40, %v1080_v37 }
 0x12e   :  { %v336_v46 = vmax.f32 %v298_v42, 0.0  ;;  %v301_v47 = vadd.f32 %v1082_v43, %v1636_v1  ;;  %v543_v43 = vmax.f32 %v523_v30, 0.0 }
 0x130   :  { %v337_v52 = vmax.f32 %v301_v47, 0.0  ;;  %v1667_v53 = vadd.f32 %v537_v45, %v336_v46  ;;  %v1083_v58 = vpop.f32.mrb[20].mxu0 }
 0x131   :  { %v1084_v59 = vpop.f32.mrb[21].mxu0 }
 0x132   :  { %v1670_v60 = vadd.f32 %v538_v48, %v337_v52  ;;  %v1085_v61 = vadd.f32 %v1084_v59, %v1083_v58  ;;  %v1086_v62 = vpop.f32.mrb[22].mxu0  ;;  %v544_v48 = vmax.f32 %v526_v8, 0.0  ;;  %v274_v52 = vadd.f32 %v1620_v49, %v1636_v1 }
 0x133   :  { %v1087_v63 = vpop.f32.mrb[23].mxu0  ;;  %v266_v58 = vadd.f32 %v1616_v39, %v1636_v1 }
 0x134   :  { %v565_v4 = vpack.c.bf16 %v1670_v60, %v1667_v53  ;;  %v306_v5 = vadd.f32 %v1085_v61, %v1636_v1  ;;  %v1088_v6 = vadd.f32 %v1087_v63, %v1086_v62  ;;  %v277_v61 = vadd.f32 %v1622_v54, %v1636_v1 }
 0x135   :  { %v330_v49 = vmax.f32 %v274_v52, 0.0 }
 0x136   :  { %v338_v9 = vmax.f32 %v306_v5, 0.0  ;;  %v309_v10 = vadd.f32 %v1088_v6, %v1636_v1 }
 0x138   :  { %v1676_v11 = vadd.f32 %v539_v2, %v338_v9  ;;  %v339_v12 = vmax.f32 %v309_v10, 0.0  ;;  %v1089_v55 = vpop.f32.mrb[24].mxu0  ;;  %v269_v2 = vadd.f32 %v1618_v44, %v1636_v1 }
 0x139   :  { %v1090_v15 = vpop.f32.mrb[25].mxu0 }
 0x13a   :  { %v1680_v16 = vadd.f32 %v540_v51, %v339_v12  ;;  %v1091_v17 = vadd.f32 %v1090_v15, %v1089_v55  ;;  %v1092_v19 = vpop.f32.mrb[26].mxu0  ;;  %v328_v12 = vmax.f32 %v266_v58, 0.0  ;;  %v331_v15 = vmax.f32 %v277_v61, 0.0 }
 0x13b   :  { %v1093_v21 = vpop.f32.mrb[27].mxu0  ;;  %v329_v20 = vmax.f32 %v269_v2, 0.0 }
 0x13c   :  { %v566_v22 = vpack.c.bf16 %v1680_v16, %v1676_v11  ;;  %v314_v24 = vadd.f32 %v1091_v17, %v1636_v1  ;;  %v1094_v25 = vadd.f32 %v1093_v21, %v1092_v19 }
 0x13e   :  { %v340_v27 = vmax.f32 %v314_v24, 0.0  ;;  %v317_v28 = vadd.f32 %v1094_v25, %v1636_v1 }
 0x140   :  { %v341_v31 = vmax.f32 %v317_v28, 0.0  ;;  %v557_v32 = vadd.f32 %v541_v26, %v340_v27  ;;  %v1095_v33 = vpop.f32.mrb[28].mxu0 }
 0x141   :  { %v1096_v35 = vpop.f32.mrb[29].mxu0 }
 0x142   :  { %v558_v37 = vadd.f32 %v542_v3, %v341_v31  ;;  %v1097_v38 = vadd.f32 %v1096_v35, %v1095_v33  ;;  %v1098_v40 = vpop.f32.mrb[30].mxu0 }
 0x143   :  { %v1099_v42 = vpop.f32.mrb[31].mxu0 }
 0x144   :  { %v567_v45 = vpack.c.bf16 %v558_v37, %v557_v32  ;;  %v322_v46 = vadd.f32 %v1097_v38, %v1636_v1  ;;  %v1100_v47 = vadd.f32 %v1099_v42, %v1098_v40 }
 0x146   :  { %v342_v50 = vmax.f32 %v322_v46, 0.0  ;;  %v325_v0 = vadd.f32 %v1100_v47, %v1636_v1 }
 0x148   :  { %v559_v7 = vadd.f32 %v543_v43, %v342_v50  ;;  %v343_v59 = vmax.f32 %v325_v0, 0.0  ;;  %v1123_v57 = vpop.f32.mrb[32].mxu0 }
 0x149   :  { %v475_v62 = vadd.f32 %v1123_v57, %v1627_v56  ;;  %v466_v63 = vpop.f32.mrb[33].mxu0 }
 0x14a   :  { %v560_v5 = vadd.f32 %v544_v48, %v343_v59  ;;  %v467_v6 = vadd.f32 %v1627_v56, %v466_v63  ;;  %v1124_v51 = vpop.f32.mrb[34].mxu0 }
 0x14b   :  { %v531_v9 = vmax.f32 %v475_v62, 0.0  ;;  %v478_v39 = vadd.f32 %v1124_v51, %v1627_v56  ;;  %v469_v10 = vpop.f32.mrb[35].mxu0 }
 0x14c   :  { %v568_v55 = vpack.c.bf16 %v560_v5, %v559_v7  ;;  %v529_v13 = vmax.f32 %v467_v6, 0.0  ;;  %v470_v54 = vadd.f32 %v1627_v56, %v469_v10  ;;  %v579_v56 = vlaneseq }
 0x14d   :  { %v547_v17 = vadd.f32 %v531_v9, %v330_v49  ;;  %v532_v19 = vmax.f32 %v478_v39, 0.0 }
 0x14e   :  { %v545_v21 = vadd.f32 %v529_v13, %v328_v12  ;;  %v530_v44 = vmax.f32 %v470_v54, 0.0  ;;  %v580_v14 = vshrl.u32 %v579_v56, 7 }
 0x14f   :  { %v548_v1 = vadd.f32 %v532_v19, %v331_v15 }
 0x150   :  { %v546_v24 = vadd.f32 %v530_v44, %v329_v20  ;;  %v581_v18 = vsub.s32 0, %v580_v14  ;;  %v585_v29 = vsub.s32 1, %v580_v14 }
 0x151   :  { %v562_v25 = vpack.c.bf16 %v548_v1, %v547_v17 }
 0x152   :  { %v561_v26 = vpack.c.bf16 %v546_v24, %v545_v21 }
 0x154   :  { %1029 = vmatmul.mubr.msk.bf16.vlgmr.msra.gmra.mrb[12].mxu1 %vm407_vm0, %v561_v26 }
 0x155   :  { %695 = vmatprep.mubr.bf16.mxu1 %v1324_v36 }
 0x15c   :  { %1030 = vmatmul.mubr.msk.bf16.gmra.mrb[16].mxu1 %vm407_vm0, %v562_v25 }
 0x15d   :  { %705 = vmatprep.mubr.bf16.mxu1 %v1324_v36 }
 0x164   :  { %1031 = vmatmul.mubr.msk.bf16.gmra.mrb[20].mxu1 %vm407_vm0, %v563_v23  ;;  %v577_v23 = vld [vmem:[%s1937_s7] sm:$0x3]  ;;  %s1325_s7 = smov [#allocation5]  }
 0x165   :  { %715 = vmatprep.mubr.bf16.mxu1 %v1324_v36  ;;  %v1736_v34 = vrot.slane %v577_v23, %v581_v18  ;;  %s963_s4 = sshll.u32 %s1325_s7, 4  ;;  %s964_s4 = int_to_ptr.vmem [resolvable:$true] %s963_s4 }
 0x166   :  { %s1271_s10 = scalar_lea.vmem %s964_s4, 2048  ;;  %p1276_p9 = scmp.lt.s32.totalorder %s964_s4, %s964_s4 }
 0x167   :  { %p1272_p8 = scmp.ne.s32.totalorder %s964_s4, %s1271_s10  ;;  %p1277_p10 = scmp.lt.s32.totalorder %s1271_s10, %s1271_s10 }
 0x169   :  { %p1278_p11 = por %p1277_p10, %p1276_p9 }
 0x16b   :  { %p1279_p12 = pnand %p1278_p11, %p1272_p8 }
 0x16c   :  { %1032 = vmatmul.mubr.msk.bf16.gmra.mrb[24].mxu1 %vm407_vm0, %v564_v41  ;;  %v1738_v41 = vrot.slane %v577_v23, %v585_v29 }
 0x16d   :  { %725 = vmatprep.mubr.bf16.mxu1 %v1324_v36 }
 0x174   :  { %1033 = vmatmul.mubr.msk.bf16.gmra.mrb[28].mxu1 %vm407_vm0, %v565_v4 }
 0x175   :  { %735 = vmatprep.mubr.bf16.mxu1 %v1324_v36 }
 0x17c   :  { %1034 = vmatmul.mubr.msk.bf16.gmra.mrb[32].mxu1 %vm407_vm0, %v566_v22 }
 0x17d   :  { %745 = vmatprep.mubr.bf16.mxu1 %v1324_v36 }
 0x184   :  { %1035 = vmatmul.mubr.msk.bf16.gmra.mrb[36].mxu1 %vm407_vm0, %v567_v45 }
 0x185   :  { %755 = vmatprep.mubr.bf16.mxu1 %v1324_v36 }
 0x18c   :  { %1036 = vmatmul.mubr.msk.bf16.gmra.mrb[40].mxu1 %vm407_vm0, %v568_v55 }
 0x227   :  { %v687_v53 = vpop.f32.mrb[12].mxu1 }
 0x228   :  { %v688_v60 = vadd.f32 %v687_v53, %v1736_v34  ;;  %v689_v4 = vpop.f32.mrb[13].mxu1 }
 0x229   :  { %v1742_v36 = vadd.f32 %v689_v4, %v1738_v41  ;;  %v691_v11 = vpop.f32.mrb[14].mxu1 }
 0x22a   :  { %v766_v16 = vmax.f32 %v688_v60, 0.0  ;;  %v692_v22 = vadd.f32 %v691_v11, %v1736_v34  ;;  %v693_v27 = vpop.f32.mrb[15].mxu1 }
 0x22b   :  { %798 = vmax.xlane.f32.xlu0 %v1742_v36  ;;  %v1747_v3 = vadd.f32 %v693_v27, %v1738_v41 }
 0x22c   :  { %782 = vst [vmem:[#allocation5] sm:$0xff] %v766_v16  ;;  %v767_v28 = vmax.f32 %v692_v22, 0.0 }
 0x22e   :  { %783 = vst [vmem:[#allocation5 + $0x8] sm:$0xff] %v767_v28 }
 0x22f   :  { %v697_v30 = vpop.f32.mrb[16].mxu1  ;;  %800 = vmax.xlane.f32.xlu0 %v1747_v3 }
 0x230   :  { %v698_v31 = vadd.f32 %v697_v30, %v1736_v34  ;;  %v699_v32 = vpop.f32.mrb[17].mxu1 }
 0x231   :  { %v1752_v33 = vadd.f32 %v699_v32, %v1738_v41  ;;  %v701_v35 = vpop.f32.mrb[18].mxu1 }
 0x232   :  { %v768_v8 = vmax.f32 %v698_v31, 0.0  ;;  %v702_v37 = vadd.f32 %v701_v35, %v1736_v34  ;;  %v703_v38 = vpop.f32.mrb[19].mxu1 }
 0x233   :  { %802 = vmax.xlane.f32.xlu1 %v1752_v33  ;;  %v1757_v42 = vadd.f32 %v703_v38, %v1738_v41 }
 0x234   :  { %784 = vst [vmem:[#allocation5 + $0x10] sm:$0xff] %v768_v8  ;;  %v769_v40 = vmax.f32 %v702_v37, 0.0 }
 0x236   :  { %785 = vst [vmem:[#allocation5 + $0x18] sm:$0xff] %v769_v40 }
 0x237   :  { %v707_v43 = vpop.f32.mrb[20].mxu1  ;;  %804 = vmax.xlane.f32.xlu1 %v1757_v42 }
 0x238   :  { %v708_v45 = vadd.f32 %v707_v43, %v1736_v34  ;;  %v709_v46 = vpop.f32.mrb[21].mxu1 }
 0x239   :  { %v1762_v47 = vadd.f32 %v709_v46, %v1738_v41  ;;  %v711_v48 = vpop.f32.mrb[22].mxu1 }
 0x23a   :  { %v770_v50 = vmax.f32 %v708_v45, 0.0  ;;  %v712_v0 = vadd.f32 %v711_v48, %v1736_v34  ;;  %v713_v52 = vpop.f32.mrb[23].mxu1 }
 0x23b   :  { %v1766_v58 = vadd.f32 %v713_v52, %v1738_v41  ;;  %806 = vmax.xlane.f32.xlu0 %v1762_v47 }
 0x23c   :  { %786 = vst [vmem:[#allocation5 + $0x20] sm:$0xff] %v770_v50  ;;  %v771_v7 = vmax.f32 %v712_v0, 0.0 }
 0x23d   :  { %808 = vmax.xlane.f32.xlu1 %v1766_v58 }
 0x23e   :  { %787 = vst [vmem:[#allocation5 + $0x28] sm:$0xff] %v771_v7 }
 0x23f   :  { %v717_v59 = vpop.f32.mrb[24].mxu1 }
 0x240   :  { %v718_v57 = vadd.f32 %v717_v59, %v1736_v34  ;;  %v719_v61 = vpop.f32.mrb[25].mxu1 }
 0x241   :  { %v1772_v62 = vadd.f32 %v719_v61, %v1738_v41  ;;  %v721_v63 = vpop.f32.mrb[26].mxu1 }
 0x242   :  { %v772_v2 = vmax.f32 %v718_v57, 0.0  ;;  %v722_v5 = vadd.f32 %v721_v63, %v1736_v34  ;;  %v723_v6 = vpop.f32.mrb[27].mxu1 }
 0x243   :  { %v1776_v51 = vadd.f32 %v723_v6, %v1738_v41  ;;  %810 = vmax.xlane.f32.xlu0 %v1772_v62 }
 0x244   :  { %788 = vst [vmem:[#allocation5 + $0x30] sm:$0xff] %v772_v2  ;;  %v773_v49 = vmax.f32 %v722_v5, 0.0 }
 0x245   :  { %812 = vmax.xlane.f32.xlu1 %v1776_v51 }
 0x246   :  { %789 = vst [vmem:[#allocation5 + $0x38] sm:$0xff] %v773_v49 }
 0x247   :  { %v727_v9 = vpop.f32.mrb[28].mxu1 }
 0x248   :  { %v728_v39 = vadd.f32 %v727_v9, %v1736_v34  ;;  %v729_v10 = vpop.f32.mrb[29].mxu1 }
 0x249   :  { %v1782_v12 = vadd.f32 %v729_v10, %v1738_v41  ;;  %v731_v55 = vpop.f32.mrb[30].mxu1 }
 0x24a   :  { %v774_v13 = vmax.f32 %v728_v39, 0.0  ;;  %v732_v54 = vadd.f32 %v731_v55, %v1736_v34  ;;  %v733_v15 = vpop.f32.mrb[31].mxu1 }
 0x24b   :  { %v1786_v17 = vadd.f32 %v733_v15, %v1738_v41  ;;  %814 = vmax.xlane.f32.xlu0 %v1782_v12 }
 0x24c   :  { %790 = vst [vmem:[#allocation5 + $0x40] sm:$0xff] %v774_v13  ;;  %v775_v19 = vmax.f32 %v732_v54, 0.0 }
 0x24d   :  { %816 = vmax.xlane.f32.xlu1 %v1786_v17 }
 0x24e   :  { %791 = vst [vmem:[#allocation5 + $0x48] sm:$0xff] %v775_v19 }
 0x24f   :  { %v737_v20 = vpop.f32.mrb[32].mxu1 }
 0x250   :  { %v738_v21 = vadd.f32 %v737_v20, %v1736_v34  ;;  %v739_v44 = vpop.f32.mrb[33].mxu1 }
 0x251   :  { %v1792_v1 = vadd.f32 %v739_v44, %v1738_v41  ;;  %v741_v24 = vpop.f32.mrb[34].mxu1 }
 0x252   :  { %v776_v25 = vmax.f32 %v738_v21, 0.0  ;;  %v742_v26 = vadd.f32 %v741_v24, %v1736_v34  ;;  %v743_v56 = vpop.f32.mrb[35].mxu1 }
 0x253   :  { %v1796_v14 = vadd.f32 %v743_v56, %v1738_v41  ;;  %818 = vmax.xlane.f32.xlu0 %v1792_v1 }
 0x254   :  { %792 = vst [vmem:[#allocation5 + $0x50] sm:$0xff] %v776_v25  ;;  %v777_v18 = vmax.f32 %v742_v26, 0.0 }
 0x255   :  { %820 = vmax.xlane.f32.xlu1 %v1796_v14 }
 0x256   :  { %793 = vst [vmem:[#allocation5 + $0x58] sm:$0xff] %v777_v18 }
 0x257   :  { %v747_v23 = vpop.f32.mrb[36].mxu1 }
 0x258   :  { %v748_v29 = vadd.f32 %v747_v23, %v1736_v34  ;;  %v749_v53 = vpop.f32.mrb[37].mxu1 }
 0x259   :  { %v1802_v60 = vadd.f32 %v749_v53, %v1738_v41  ;;  %v751_v4 = vpop.f32.mrb[38].mxu1 }
 0x25a   :  { %v778_v11 = vmax.f32 %v748_v29, 0.0  ;;  %v752_v16 = vadd.f32 %v751_v4, %v1736_v34  ;;  %v753_v22 = vpop.f32.mrb[39].mxu1 }
 0x25b   :  { %v1806_v27 = vadd.f32 %v753_v22, %v1738_v41  ;;  %822 = vmax.xlane.f32.xlu0 %v1802_v60 }
 0x25c   :  { %794 = vst [vmem:[#allocation5 + $0x60] sm:$0xff] %v778_v11  ;;  %v779_v28 = vmax.f32 %v752_v16, 0.0 }
 0x25d   :  { %824 = vmax.xlane.f32.xlu1 %v1806_v27 }
 0x25e   :  { %795 = vst [vmem:[#allocation5 + $0x68] sm:$0xff] %v779_v28 }
 0x25f   :  { %v757_v30 = vpop.f32.mrb[40].mxu1 }
 0x260   :  { %v758_v31 = vadd.f32 %v757_v30, %v1736_v34  ;;  %v759_v32 = vpop.f32.mrb[41].mxu1 }
 0x261   :  { %v1812_v35 = vadd.f32 %v759_v32, %v1738_v41  ;;  %v761_v8 = vpop.f32.mrb[42].mxu1 }
 0x262   :  { %v780_v37 = vmax.f32 %v758_v31, 0.0  ;;  %v762_v38 = vadd.f32 %v761_v8, %v1736_v34  ;;  %v763_v40 = vpop.f32.mrb[43].mxu1 }
 0x263   :  { %v1816_v43 = vadd.f32 %v763_v40, %v1738_v41  ;;  %826 = vmax.xlane.f32.xlu0 %v1812_v35 }
 0x264   :  { %796 = vst [vmem:[#allocation5 + $0x70] sm:$0xff] %v780_v37  ;;  %v781_v45 = vmax.f32 %v762_v38, 0.0 }
 0x265   :  { %828 = vmax.xlane.f32.xlu1 %v1816_v43 }
 0x266   :  { %797 = vst [vmem:[#allocation5 + $0x78] sm:$0xff] %v781_v45 }
 0x2b8   :  { %v799_v46 = vpop.xlane.xlu0 %798 }
 0x2b9   :  { %v830_v48 = vsub.f32 %v1742_v36, %v799_v46 }
 0x2bb   :  { %v846_v50 = vmul.f32 1.442695, %v830_v48 }
 0x2bc   :  { %v801_v0 = vpop.xlane.xlu0 %800 }
 0x2bd   :  { %1185 = vpow2.f32 %v846_v50  ;;  %v831_v52 = vsub.f32 %v1747_v3, %v801_v0 }
 0x2bf   :  { %v848_v34 = vmul.f32 1.442695, %v831_v52 }
 0x2c0   :  { %v803_v7 = vpop.xlane.xlu1 %802 }
 0x2c1   :  { %1187 = vpow2.f32 %v848_v34  ;;  %v832_v41 = vsub.f32 %v1752_v33, %v803_v7 }
 0x2c3   :  { %v850_v59 = vmul.f32 1.442695, %v832_v41 }
 0x2c4   :  { %v805_v57 = vpop.xlane.xlu1 %804 }
 0x2c5   :  { %1189 = vpow2.f32 %v850_v59  ;;  %v833_v61 = vsub.f32 %v1757_v42, %v805_v57 }
 0x2c7   :  { %v1824_v63 = vpop.eup %1185  ;;  %v852_v2 = vmul.f32 1.442695, %v833_v61 }
 0x2c8   :  { %878 = vadd.xlane.f32.xlu0 %v1824_v63  ;;  %v807_v36 = vpop.xlane.xlu0 %806 }
 0x2c9   :  { %1191 = vpow2.f32 %v852_v2  ;;  %v834_v5 = vsub.f32 %v1762_v47, %v807_v36 }
 0x2ca   :  { %v809_v3 = vpop.xlane.xlu1 %808 }
 0x2cb   :  { %v1828_v6 = vpop.eup %1187  ;;  %v854_v49 = vmul.f32 1.442695, %v834_v5  ;;  %v835_v33 = vsub.f32 %v1766_v58, %v809_v3 }
 0x2cc   :  { %880 = vadd.xlane.f32.xlu1 %v1828_v6 }
 0x2cd   :  { %1193 = vpow2.f32 %v854_v49  ;;  %v856_v9 = vmul.f32 1.442695, %v835_v33 }
 0x2cf   :  { %v1832_v42 = vpop.eup %1189  ;;  %1195 = vpow2.f32 %v856_v9 }
 0x2d0   :  { %882 = vadd.xlane.f32.xlu0 %v1832_v42  ;;  %v811_v39 = vpop.xlane.xlu0 %810 }
 0x2d1   :  { %v836_v10 = vsub.f32 %v1772_v62, %v811_v39 }
 0x2d2   :  { %v813_v55 = vpop.xlane.xlu1 %812 }
 0x2d3   :  { %v1836_v47 = vpop.eup %1191  ;;  %v858_v13 = vmul.f32 1.442695, %v836_v10  ;;  %v837_v54 = vsub.f32 %v1776_v51, %v813_v55 }
 0x2d4   :  { %884 = vadd.xlane.f32.xlu1 %v1836_v47 }
 0x2d5   :  { %1197 = vpow2.f32 %v858_v13  ;;  %v860_v58 = vmul.f32 1.442695, %v837_v54 }
 0x2d7   :  { %v1840_v15 = vpop.eup %1193  ;;  %1199 = vpow2.f32 %v860_v58 }
 0x2d8   :  { %886 = vadd.xlane.f32.xlu0 %v1840_v15  ;;  %v815_v19 = vpop.xlane.xlu0 %814 }
 0x2d9   :  { %v1843_v20 = vpop.eup %1195  ;;  %v838_v62 = vsub.f32 %v1782_v12, %v815_v19 }
 0x2da   :  { %v817_v21 = vpop.xlane.xlu1 %816  ;;  %888 = vadd.xlane.f32.xlu1 %v1843_v20 }
 0x2db   :  { %v862_v44 = vmul.f32 1.442695, %v838_v62  ;;  %v839_v51 = vsub.f32 %v1786_v17, %v817_v21 }
 0x2dd   :  { %1201 = vpow2.f32 %v862_v44  ;;  %v864_v24 = vmul.f32 1.442695, %v839_v51 }
 0x2df   :  { %v1848_v25 = vpop.eup %1197  ;;  %1203 = vpow2.f32 %v864_v24 }
 0x2e0   :  { %890 = vadd.xlane.f32.xlu0 %v1848_v25  ;;  %v819_v26 = vpop.xlane.xlu0 %818 }
 0x2e1   :  { %v1851_v56 = vpop.eup %1199  ;;  %v840_v18 = vsub.f32 %v1792_v1, %v819_v26 }
 0x2e2   :  { %v821_v23 = vpop.xlane.xlu1 %820  ;;  %892 = vadd.xlane.f32.xlu1 %v1851_v56 }
 0x2e3   :  { %v866_v12 = vmul.f32 1.442695, %v840_v18  ;;  %v841_v29 = vsub.f32 %v1796_v14, %v821_v23 }
 0x2e5   :  { %1205 = vpow2.f32 %v866_v12  ;;  %v868_v17 = vmul.f32 1.442695, %v841_v29 }
 0x2e7   :  { %v1856_v53 = vpop.eup %1201  ;;  %1207 = vpow2.f32 %v868_v17 }
 0x2e8   :  { %894 = vadd.xlane.f32.xlu0 %v1856_v53  ;;  %v823_v4 = vpop.xlane.xlu0 %822 }
 0x2e9   :  { %v1859_v11 = vpop.eup %1203  ;;  %v842_v16 = vsub.f32 %v1802_v60, %v823_v4 }
 0x2ea   :  { %v825_v22 = vpop.xlane.xlu1 %824  ;;  %896 = vadd.xlane.f32.xlu1 %v1859_v11 }
 0x2eb   :  { %v870_v1 = vmul.f32 1.442695, %v842_v16  ;;  %v843_v28 = vsub.f32 %v1806_v27, %v825_v22 }
 0x2ed   :  { %1209 = vpow2.f32 %v870_v1  ;;  %v872_v14 = vmul.f32 1.442695, %v843_v28 }
 0x2ef   :  { %v1864_v30 = vpop.eup %1205  ;;  %1211 = vpow2.f32 %v872_v14 }
 0x2f0   :  { %898 = vadd.xlane.f32.xlu0 %v1864_v30  ;;  %v827_v31 = vpop.xlane.xlu0 %826 }
 0x2f1   :  { %v1867_v32 = vpop.eup %1207  ;;  %v844_v8 = vsub.f32 %v1812_v35, %v827_v31 }
 0x2f2   :  { %v829_v37 = vpop.xlane.xlu1 %828  ;;  %900 = vadd.xlane.f32.xlu1 %v1867_v32 }
 0x2f3   :  { %v874_v60 = vmul.f32 1.442695, %v844_v8  ;;  %v845_v38 = vsub.f32 %v1816_v43, %v829_v37 }
 0x2f5   :  { %1213 = vpow2.f32 %v874_v60  ;;  %v876_v27 = vmul.f32 1.442695, %v845_v38 }
 0x2f7   :  { %v1872_v40 = vpop.eup %1209  ;;  %1215 = vpow2.f32 %v876_v27 }
 0x2f8   :  { %902 = vadd.xlane.f32.xlu0 %v1872_v40 }
 0x2f9   :  { %v1875_v45 = vpop.eup %1211 }
 0x2fa   :  { %904 = vadd.xlane.f32.xlu1 %v1875_v45 }
 0x2ff   :  { %v1878_v46 = vpop.eup %1213 }
 0x300   :  { %906 = vadd.xlane.f32.xlu0 %v1878_v46 }
 0x301   :  { %v1881_v35 = vpop.eup %1215 }
 0x302   :  { %908 = vadd.xlane.f32.xlu1 %v1881_v35 }
 0x303   :  { %1282 = shalt.err (!%p1279_p12)
}
 0x304   :  { %s1283_s13 = scalar_lea.hbm %s1938_s8, 2048 }
 0x305   :  { %p1284_p13 = scmp.ne.s32.totalorder %s1938_s8, %s1283_s13  ;;  %p1287_p0 = scmp.lt.u32.totalorder %s1283_s13, %s1938_s8 }
 0x307   :  { %p1289_p1 = pnand %p1287_p0, %p1284_p13 }
 0x309   :  { %1292 = shalt.err (!%p1289_p1)
}
 0x30a   :  { %s1326_s17 = smov 128   ;;  %s1327_s18 = smov 8  }
 0x30b   :  { %969 = dma.vmem_to_hbm [thread:$0]  %s964_s4, 2048, %s1938_s8, [#allocation4], %s1326_s17, %s1326_s17, %s1327_s18  }
 0x30c   :  { %s1328_s8 = smov [#allocation6]  }
 0x30d   :  { %s975_s21 = sshll.u32 %s1328_s8, 4  ;;  %s976_s21 = int_to_ptr.vmem [resolvable:$true] %s975_s21 }
 0x30e   :  { %s1293_s1 = scalar_lea.vmem %s976_s21, 2048  ;;  %p1298_p3 = scmp.lt.s32.totalorder %s976_s21, %s976_s21 }
 0x30f   :  { %p1294_p2 = scmp.ne.s32.totalorder %s976_s21, %s1293_s1  ;;  %p1299_p4 = scmp.lt.s32.totalorder %s1293_s1, %s1293_s1 }
 0x311   :  { %p1300_p5 = por %p1299_p4, %p1298_p3 }
 0x313   :  { %p1301_p6 = pnand %p1300_p5, %p1294_p2 }
 0x355   :  { %v879_v43 = vpop.xlane.xlu0 %878 }
 0x356   :  { %1217 = vrcp.f32 %v879_v43 }
 0x359   :  { %v881_v48 = vpop.xlane.xlu1 %880 }
 0x35a   :  { %1219 = vrcp.f32 %v881_v48 }
 0x35d   :  { %v883_v50 = vpop.xlane.xlu0 %882 }
 0x35e   :  { %1221 = vrcp.f32 %v883_v50 }
 0x360   :  { %v1218_v0 = vpop.eup %1217 }
 0x361   :  { %v911_v52 = vmul.f32 %v1218_v0, %v1824_v63  ;;  %v885_v34 = vpop.xlane.xlu1 %884 }
 0x362   :  { %1223 = vrcp.f32 %v885_v34 }
 0x363   :  { %942 = vst [vmem:[#allocation6] sm:$0xff] %v911_v52 }
 0x364   :  { %v1220_v7 = vpop.eup %1219 }
 0x365   :  { %v913_v41 = vmul.f32 %v1220_v7, %v1828_v6  ;;  %v887_v59 = vpop.xlane.xlu0 %886 }
 0x366   :  { %1225 = vrcp.f32 %v887_v59 }
 0x367   :  { %943 = vst [vmem:[#allocation6 + $0x8] sm:$0xff] %v913_v41  ;;  %v889_v57 = vpop.xlane.xlu1 %888 }
 0x368   :  { %v1222_v61 = vpop.eup %1221  ;;  %1227 = vrcp.f32 %v889_v57 }
 0x369   :  { %v915_v2 = vmul.f32 %v1222_v61, %v1832_v42 }
 0x36b   :  { %944 = vst [vmem:[#allocation6 + $0x10] sm:$0xff] %v915_v2 }
 0x36c   :  { %v1224_v36 = vpop.eup %1223 }
 0x36d   :  { %v917_v5 = vmul.f32 %v1224_v36, %v1836_v47  ;;  %v891_v3 = vpop.xlane.xlu0 %890 }
 0x36e   :  { %1229 = vrcp.f32 %v891_v3 }
 0x36f   :  { %945 = vst [vmem:[#allocation6 + $0x18] sm:$0xff] %v917_v5  ;;  %v893_v63 = vpop.xlane.xlu1 %892 }
 0x370   :  { %v1226_v49 = vpop.eup %1225  ;;  %1231 = vrcp.f32 %v893_v63 }
 0x371   :  { %v919_v6 = vmul.f32 %v1226_v49, %v1840_v15 }
 0x372   :  { %v1228_v33 = vpop.eup %1227 }
 0x373   :  { %946 = vst [vmem:[#allocation6 + $0x20] sm:$0xff] %v919_v6  ;;  %v921_v9 = vmul.f32 %v1228_v33, %v1843_v20 }
 0x375   :  { %947 = vst [vmem:[#allocation6 + $0x28] sm:$0xff] %v921_v9  ;;  %v895_v39 = vpop.xlane.xlu0 %894 }
 0x376   :  { %1233 = vrcp.f32 %v895_v39 }
 0x377   :  { %v897_v42 = vpop.xlane.xlu1 %896 }
 0x378   :  { %v1230_v10 = vpop.eup %1229  ;;  %1235 = vrcp.f32 %v897_v42 }
 0x379   :  { %v923_v55 = vmul.f32 %v1230_v10, %v1848_v25 }
 0x37a   :  { %v1232_v47 = vpop.eup %1231 }
 0x37b   :  { %948 = vst [vmem:[#allocation6 + $0x30] sm:$0xff] %v923_v55  ;;  %v925_v13 = vmul.f32 %v1232_v47, %v1851_v56 }
 0x37d   :  { %949 = vst [vmem:[#allocation6 + $0x38] sm:$0xff] %v925_v13  ;;  %v899_v54 = vpop.xlane.xlu0 %898 }
 0x37e   :  { %1237 = vrcp.f32 %v899_v54 }
 0x37f   :  { %v901_v58 = vpop.xlane.xlu1 %900 }
 0x380   :  { %v1234_v15 = vpop.eup %1233  ;;  %1239 = vrcp.f32 %v901_v58 }
 0x381   :  { %v927_v19 = vmul.f32 %v1234_v15, %v1856_v53 }
 0x382   :  { %v1236_v20 = vpop.eup %1235 }
 0x383   :  { %950 = vst [vmem:[#allocation6 + $0x40] sm:$0xff] %v927_v19  ;;  %v929_v62 = vmul.f32 %v1236_v20, %v1859_v11 }
 0x385   :  { %951 = vst [vmem:[#allocation6 + $0x48] sm:$0xff] %v929_v62  ;;  %v903_v21 = vpop.xlane.xlu0 %902 }
 0x386   :  { %1241 = vrcp.f32 %v903_v21 }
 0x387   :  { %v905_v44 = vpop.xlane.xlu1 %904 }
 0x388   :  { %v1238_v51 = vpop.eup %1237  ;;  %1243 = vrcp.f32 %v905_v44 }
 0x389   :  { %v931_v24 = vmul.f32 %v1238_v51, %v1864_v30 }
 0x38a   :  { %v1240_v25 = vpop.eup %1239 }
 0x38b   :  { %952 = vst [vmem:[#allocation6 + $0x50] sm:$0xff] %v931_v24  ;;  %v933_v26 = vmul.f32 %v1240_v25, %v1867_v32 }
 0x38d   :  { %953 = vst [vmem:[#allocation6 + $0x58] sm:$0xff] %v933_v26  ;;  %v907_v56 = vpop.xlane.xlu0 %906 }
 0x38e   :  { %1245 = vrcp.f32 %v907_v56 }
 0x38f   :  { %v909_v18 = vpop.xlane.xlu1 %908 }
 0x390   :  { %v1242_v23 = vpop.eup %1241  ;;  %1247 = vrcp.f32 %v909_v18 }
 0x391   :  { %v935_v12 = vmul.f32 %v1242_v23, %v1872_v40 }
 0x392   :  { %v1244_v29 = vpop.eup %1243 }
 0x393   :  { %954 = vst [vmem:[#allocation6 + $0x60] sm:$0xff] %v935_v12  ;;  %v937_v17 = vmul.f32 %v1244_v29, %v1875_v45 }
 0x395   :  { %955 = vst [vmem:[#allocation6 + $0x68] sm:$0xff] %v937_v17 }
 0x398   :  { %v1246_v53 = vpop.eup %1245 }
 0x399   :  { %v939_v4 = vmul.f32 %v1246_v53, %v1878_v46 }
 0x39a   :  { %v1248_v11 = vpop.eup %1247 }
 0x39b   :  { %956 = vst [vmem:[#allocation6 + $0x70] sm:$0xff] %v939_v4  ;;  %v941_v16 = vmul.f32 %v1248_v11, %v1881_v35 }
 0x39d   :  { %957 = vst [vmem:[#allocation6 + $0x78] sm:$0xff] %v941_v16 }
 0x39e   :  { %1304 = shalt.err (!%p1301_p6)
}
 0x39f   :  { %s1305_s24 = scalar_lea.hbm %s1939_s9, 2048 }
 0x3a0   :  { %p1306_p7 = scmp.ne.s32.totalorder %s1939_s9, %s1305_s24  ;;  %p1309_p8 = scmp.lt.u32.totalorder %s1305_s24, %s1939_s9 }
 0x3a2   :  { %p1311_p9 = pnand %p1309_p8, %p1306_p7 }
 0x3a4   :  { %1314 = shalt.err (!%p1311_p9)
}
 0x3a5   :  { %981 = dma.vmem_to_hbm [thread:$0]  %s976_s21, 2048, %s1939_s9, [#allocation7], %s1326_s17, %s1326_s17, %s1327_s18  }
 0x3a6   :  { %1317 = dma.done.wait [#allocation4], 2048  }
 0x3a7   :  { %1318 = vsyncadd [#allocation4], 4294965248 }
 0x3a8   :  { %1319 = dma.done.wait [#allocation7], 2048  }
 0x3a9   :  { %1320 = vsyncadd [#allocation7], 4294965248 }
 0x3aa   :  { %988 = vsyncpa [#allocation3], 1 }
 0x3ab   :  { %989 = vsyncpa [#allocation4], 1 }
 0x3ac   :  { %990 = vsyncpa [#allocation7], 1 }

</bundles_post_ra>
